<compile_context>
chip_gen: v5e
topology: v5e:2x2
jax: 0.10.0
libtpu: 0.0.40
codegen_flags: <defaults>
</compile_context>

<pallas_src>
import jax
import jax.numpy as jnp
from jax.experimental import pallas as pl
from jax.experimental.pallas import tpu as pltpu


def dqn_kernel(x_ref, w1_ref, b1_ref, w2_ref, b2_ref, o_ref):
    # Hidden layer: W1 @ x_tile + b1, ReLU.  (MXU matmul + VPU elementwise)
    h = jnp.dot(w1_ref[...], x_ref[...], preferred_element_type=jnp.float32)
    h = jnp.maximum(h + b1_ref[...], 0.0)
    # Output layer: W2 @ h + b2 -> (action_dim, TB), lane-dense store.
    out = jnp.dot(w2_ref[...], h, preferred_element_type=jnp.float32)
    o_ref[...] = (out + b2_ref[...]).astype(o_ref.dtype)


def dqn_forward(x, w1, b1, w2, b2, *, tb=512):
    """x: (B, state_dim); w1: (hidden, state_dim); b1: (hidden,);
    w2: (action_dim, hidden); b2: (action_dim,).  Returns (B, action_dim) f32."""
    B, state_dim = x.shape
    hidden = w1.shape[0]
    action_dim = w2.shape[0]

    # Pad batch to a multiple of 128 lanes, pick a tile size, then pad to the tile.
    b_pad = ((B + 127) // 128) * 128
    tb = min(tb, b_pad)
    b_pad = ((b_pad + tb - 1) // tb) * tb

    # Feature-major x: (state_dim, B_pad), zero-padded batch columns.
    x_t = jnp.zeros((state_dim, b_pad), x.dtype).at[:, :B].set(x.T)
    b1c = b1.reshape(hidden, 1).astype(jnp.float32)
    b2c = b2.reshape(action_dim, 1).astype(jnp.float32)

    out_t = pl.pallas_call(
        dqn_kernel,
        out_shape=jax.ShapeDtypeStruct((action_dim, b_pad), jnp.float32),
        grid=(b_pad // tb,),
        in_specs=[
            # streamed / pipelined over the batch
            pl.BlockSpec((state_dim, tb), lambda i: (0, i)),
            # weights & biases resident in VMEM across all grid steps
            pl.BlockSpec((hidden, state_dim), lambda i: (0, 0)),
            pl.BlockSpec((hidden, 1), lambda i: (0, 0)),
            pl.BlockSpec((action_dim, hidden), lambda i: (0, 0)),
            pl.BlockSpec((action_dim, 1), lambda i: (0, 0)),
        ],
        out_specs=pl.BlockSpec((action_dim, tb), lambda i: (0, i)),
        compiler_params=pltpu.CompilerParams(
            dimension_semantics=("parallel",)
        ),
    )(x_t, w1, b1c, w2, b2c)

    # Back to batch-major, drop batch padding.
    return out_t[:, :B].T


def init_params(key, state_dim=4, hidden=128, action_dim=4):
    """PyTorch-convention params: W [out, in], b [out]; uniform +/- 1/sqrt(fan_in)."""
    k1, k2, k3, k4 = jax.random.split(key, 4)
    bound1 = 1.0 / jnp.sqrt(state_dim)
    bound2 = 1.0 / jnp.sqrt(hidden)
    w1 = jax.random.uniform(k1, (hidden, state_dim), jnp.float32, -bound1, bound1)
    b1 = jax.random.uniform(k2, (hidden,), jnp.float32, -bound1, bound1)
    w2 = jax.random.uniform(k3, (action_dim, hidden), jnp.float32, -bound2, bound2)
    b2 = jax.random.uniform(k4, (action_dim,), jnp.float32, -bound2, bound2)
    return w1, b1, w2, b2


if __name__ == "__main__":
    key = jax.random.PRNGKey(0)
    k_x, k_p = jax.random.split(key)

    B, state_dim, hidden, action_dim = 8, 4, 128, 4
    x = jax.random.normal(k_x, (B, state_dim), jnp.float32)
    w1, b1, w2, b2 = init_params(k_p, state_dim, hidden, action_dim)

    out = dqn_forward(x, w1, b1, w2, b2)
    out = jax.block_until_ready(out)

    # Reference check in plain JAX (PyTorch semantics: x @ W^T + b)
    ref = jnp.maximum(x @ w1.T + b1, 0.0) @ w2.T + b2
    assert out.shape == (B, action_dim)
    assert jnp.allclose(out, ref, atol=1e-4, rtol=1e-5)

    print("KERNEL_OK")
</pallas_src>

<mosaic_0001>
module attributes {stable_mosaic.version = 11 : i64} {
  func.func @dqn_kernel(%arg0: i32, %arg1: memref<4x128xf32, #tpu.memory_space<vmem>>, %arg2: memref<128x4xf32, #tpu.memory_space<vmem>>, %arg3: memref<128x1xf32, #tpu.memory_space<vmem>>, %arg4: memref<4x128xf32, #tpu.memory_space<vmem>>, %arg5: memref<4x1xf32, #tpu.memory_space<vmem>>, %arg6: memref<4x128xf32, #tpu.memory_space<vmem>>) attributes {dimension_semantics = [#tpu.dimension_semantics<parallel>], iteration_bounds = array<i64: 1>, scalar_prefetch = 0 : i64, scratch_operands = 0 : i64, tpu.core_type = #tpu.core_type<tc>, window_params = [{transform_indices = @transform_0, window_bounds = array<i64: 4, 128>}, {pipeline_mode = #tpu.pipeline_mode<synchronous>, transform_indices = @transform_1, window_bounds = array<i64: 128, 4>}, {pipeline_mode = #tpu.pipeline_mode<synchronous>, transform_indices = @transform_2, window_bounds = array<i64: 128, 1>}, {pipeline_mode = #tpu.pipeline_mode<synchronous>, transform_indices = @transform_3, window_bounds = array<i64: 4, 128>}, {pipeline_mode = #tpu.pipeline_mode<synchronous>, transform_indices = @transform_4, window_bounds = array<i64: 4, 1>}, {transform_indices = @transform_5, window_bounds = array<i64: 4, 128>}]} {
    %c0 = arith.constant 0 : index
    %c0_0 = arith.constant 0 : index
    %0 = vector.load %arg2[%c0, %c0_0] : memref<128x4xf32, #tpu.memory_space<vmem>>, vector<128x4xf32>
    %c0_1 = arith.constant 0 : index
    %c0_2 = arith.constant 0 : index
    %1 = vector.load %arg1[%c0_1, %c0_2] : memref<4x128xf32, #tpu.memory_space<vmem>>, vector<4x128xf32>
    %cst = arith.constant dense<0.000000e+00> : vector<128x128xf32>
    %2 = tpu.matmul %0, %1, %cst {dimension_numbers = #tpu.dot_dimension_numbers<[1], [0], [0], [1], [0, 0, 1, 1], [], []>} : vector<128x4xf32>, vector<4x128xf32>, vector<128x128xf32> -> vector<128x128xf32>
    %c0_3 = arith.constant 0 : index
    %c0_4 = arith.constant 0 : index
    %3 = vector.load %arg3[%c0_3, %c0_4] : memref<128x1xf32, #tpu.memory_space<vmem>>, vector<128x1xf32>
    %4 = vector.broadcast %3 : vector<128x1xf32> to vector<128x128xf32>
    %5 = arith.addf %2, %4 : vector<128x128xf32>
    %cst_5 = arith.constant 0.000000e+00 : f32
    %6 = vector.broadcast %cst_5 : f32 to vector<128x128xf32>
    %7 = arith.maximumf %5, %6 : vector<128x128xf32>
    %c0_6 = arith.constant 0 : index
    %c0_7 = arith.constant 0 : index
    %8 = vector.load %arg4[%c0_6, %c0_7] : memref<4x128xf32, #tpu.memory_space<vmem>>, vector<4x128xf32>
    %cst_8 = arith.constant dense<0.000000e+00> : vector<4x128xf32>
    %9 = tpu.matmul %8, %7, %cst_8 {dimension_numbers = #tpu.dot_dimension_numbers<[1], [0], [0], [1], [0, 0, 1, 1], [], []>} : vector<4x128xf32>, vector<128x128xf32>, vector<4x128xf32> -> vector<4x128xf32>
    %c0_9 = arith.constant 0 : index
    %c0_10 = arith.constant 0 : index
    %10 = vector.load %arg5[%c0_9, %c0_10] : memref<4x1xf32, #tpu.memory_space<vmem>>, vector<4x1xf32>
    %11 = vector.broadcast %10 : vector<4x1xf32> to vector<4x128xf32>
    %12 = arith.addf %9, %11 : vector<4x128xf32>
    %c0_11 = arith.constant 0 : index
    %c0_12 = arith.constant 0 : index
    %13 = vector.load %arg6[%c0_11, %c0_12] : memref<4x128xf32, #tpu.memory_space<vmem>>, vector<4x128xf32>
    tpu.vector_store %arg6[%c0_11, %c0_12], %12 {strides = array<i32>} : memref<4x128xf32, #tpu.memory_space<vmem>>, vector<4x128xf32>,
    return
  }
  func.func @transform_0(%arg0: i32) -> (i32, i32) {
    %c0_i32 = arith.constant 0 : i32
    %c0_i32_0 = arith.constant 0 : i32
    return %c0_i32, %arg0 : i32, i32
  }
  func.func @transform_1(%arg0: i32) -> (i32, i32) {
    %c0_i32 = arith.constant 0 : i32
    %c0_i32_0 = arith.constant 0 : i32
    %c0_i32_1 = arith.constant 0 : i32
    return %c0_i32, %c0_i32_0 : i32, i32
  }
  func.func @transform_2(%arg0: i32) -> (i32, i32) {
    %c0_i32 = arith.constant 0 : i32
    %c0_i32_0 = arith.constant 0 : i32
    %c0_i32_1 = arith.constant 0 : i32
    return %c0_i32, %c0_i32_0 : i32, i32
  }
  func.func @transform_3(%arg0: i32) -> (i32, i32) {
    %c0_i32 = arith.constant 0 : i32
    %c0_i32_0 = arith.constant 0 : i32
    %c0_i32_1 = arith.constant 0 : i32
    return %c0_i32, %c0_i32_0 : i32, i32
  }
  func.func @transform_4(%arg0: i32) -> (i32, i32) {
    %c0_i32 = arith.constant 0 : i32
    %c0_i32_0 = arith.constant 0 : i32
    %c0_i32_1 = arith.constant 0 : i32
    return %c0_i32, %c0_i32_0 : i32, i32
  }
  func.func @transform_5(%arg0: i32) -> (i32, i32) {
    %c0_i32 = arith.constant 0 : i32
    %c0_i32_0 = arith.constant 0 : i32
    return %c0_i32, %arg0 : i32, i32
  }
}

</mosaic_0001>

<bundles_post_ra>
// kernel: tpu_custom_call.1
= control target key start
LH: loop header
LB: loop body
LE: loop exit
PB: predicated region body
PF: predicated region fallthrough
CT: control target
= control target key end

     0   :  { %vm183_vm0 = vcmask 1043456   ;;  %v362_v3 = vmov 0   ;;  %vm134_vm1 = vcmask 31744   ;;  %s524_s0 = inlined_call_operand.vmem [shape: f32[4,128], index: 0, kind: input, shape index: {}]   ;;  %s525_s1 = inlined_call_operand.vmem [shape: f32[128,4], index: 1, kind: input, shape index: {}]   ;;  %s526_s2 = inlined_call_operand.vmem [shape: f32[128,1], index: 2, kind: input, shape index: {}]   ;;  %s527_s3 = inlined_call_operand.vmem [shape: f32[4,128], index: 3, kind: input, shape index: {}]   ;;  %s528_s4 = inlined_call_operand.vmem [shape: f32[4,1], index: 4, kind: input, shape index: {}]   ;;  %s529_s5 = inlined_call_operand.hbm [shape: f32[4,128], index: 5, kind: output, shape index: {}]  }
   0x1   :  { %v37_v0 = vld [vmem:[%s524_s0] sm:$0xf]  ;;  %v53_v1 = vld [vmem:[%s526_s2 + $0x78] sm:$0xff]  ;;  %333 = vset.pattern.permute.xlu0 %v362_v3  ;;  %v27_v4 = vld [vmem:[%s525_s1 + $0x30] sm:$0xff]  ;;  %334 = vset.pattern.permute.xlu1 %v362_v3 }
   0x2   :  { %v21_v2 = vld [vmem:[%s525_s1] sm:$0xff]  ;;  %312 = vmatpush.msk.msra.mxu0 %vm183_vm0, %v37_v0  ;;  %329 = vmatpush.msk.msra.mxu2 %vm183_vm0, %v37_v0  ;;  %v51_v6 = vld [vmem:[%s526_s2 + $0x68] sm:$0xff]  ;;  %v49_v7 = vld [vmem:[%s526_s2 + $0x58] sm:$0xff] }
   0x3   :  { %v33_v5 = vld [vmem:[%s525_s1 + $0x60] sm:$0xff]  ;;  %330 = vmatpush.msk.msra.mxu3 %vm183_vm0, %v37_v0  ;;  %131 = vperm.xlu0 %333, %v53_v1   ;;  %v52_v8 = vld [vmem:[%s526_s2 + $0x70] sm:$0xff]  ;;  %v22_v9 = vld [vmem:[%s525_s1 + $0x8] sm:$0xff] }
   0x4   :  { %313 = vmatmul.msk.f32.vlgmr.msra.gmra.mxu0 %vm134_vm1, %v21_v2  ;;  %319 = vmatmul.msk.f32.vlgmr.msra.gmra.mxu2 %vm134_vm1, %v27_v4  ;;  %v28_v10 = vld [vmem:[%s525_s1 + $0x38] sm:$0xff]  ;;  %v34_v11 = vld [vmem:[%s525_s1 + $0x68] sm:$0xff] }
   0x5   :  { %325 = vmatmul.msk.f32.vlgmr.msra.gmra.mxu3 %vm134_vm1, %v33_v5  ;;  %335 = vset.pattern.permute.xlu2 %v362_v3 }
   0x6   :  { %121 = vperm.xlu1 %334, %v51_v6   ;;  %111 = vperm.xlu2 %335, %v49_v7  }
   0x7   :  { %10 = vsyncpa [#allocation3], 0  ;;  %v50_v12 = vld [vmem:[%s526_s2 + $0x60] sm:$0xff]  ;;  %v48_v13 = vld [vmem:[%s526_s2 + $0x50] sm:$0xff]  ;;  %s303_s11 = sshll.u32 %s529_s5, 4  ;;  %s304_s11 = int_to_ptr.hbm [resolvable:$true] %s303_s11 }
   0x8   :  { %v47_v14 = vld [vmem:[%s526_s2 + $0x48] sm:$0xff]  ;;  %v23_v15 = vld [vmem:[%s525_s1 + $0x10] sm:$0xff]  ;;  %v29_v16 = vld [vmem:[%s525_s1 + $0x40] sm:$0xff] }
   0x9   :  { %v35_v17 = vld [vmem:[%s525_s1 + $0x70] sm:$0xff]  ;;  %v46_v18 = vld [vmem:[%s526_s2 + $0x40] sm:$0xff]  ;;  %v45_v19 = vld [vmem:[%s526_s2 + $0x38] sm:$0xff] }
   0xa   :  { %v44_v20 = vld [vmem:[%s526_s2 + $0x30] sm:$0xff]  ;;  %v24_v21 = vld [vmem:[%s525_s1 + $0x18] sm:$0xff]  ;;  %v30_v22 = vld [vmem:[%s525_s1 + $0x48] sm:$0xff] }
   0xb   :  { %126 = vperm.xlu0 %333, %v52_v8   ;;  %v36_v23 = vld [vmem:[%s525_s1 + $0x78] sm:$0xff]  ;;  %v43_v24 = vld [vmem:[%s526_s2 + $0x28] sm:$0xff]  ;;  %v42_v25 = vld [vmem:[%s526_s2 + $0x20] sm:$0xff] }
   0xc   :  { %314 = vmatmul.msk.f32.gmra.mxu0 %vm134_vm1, %v22_v9  ;;  %320 = vmatmul.msk.f32.gmra.mxu2 %vm134_vm1, %v28_v10  ;;  %v41_v26 = vld [vmem:[%s526_s2 + $0x18] sm:$0xff]  ;;  %v25_v27 = vld [vmem:[%s525_s1 + $0x20] sm:$0xff]  ;;  %v31_v28 = vld [vmem:[%s525_s1 + $0x50] sm:$0xff] }
   0xd   :  { %326 = vmatmul.msk.f32.gmra.mxu3 %vm134_vm1, %v34_v11  ;;  %v40_v29 = vld [vmem:[%s526_s2 + $0x10] sm:$0xff]  ;;  %v39_v30 = vld [vmem:[%s526_s2 + $0x8] sm:$0xff]  ;;  %v38_v31 = vld [vmem:[%s526_s2] sm:$0xff] }
   0xe   :  { %116 = vperm.xlu1 %334, %v50_v12   ;;  %106 = vperm.xlu2 %335, %v48_v13   ;;  %v26_v32 = vld [vmem:[%s525_s1 + $0x28] sm:$0xff]  ;;  %v32_v33 = vld [vmem:[%s525_s1 + $0x58] sm:$0xff]  ;;  %v269_v34 = vld [vmem:[%s528_s4] sm:$0xf]  ;;  %s363_s4 = smov [#allocation2]  }
   0xf   :  { %s301_s8 = sshll.u32 %s363_s4, 4  ;;  %s302_s8 = int_to_ptr.vmem [resolvable:$true] %s301_s8 }
  0x13   :  { %101 = vperm.xlu0 %333, %v47_v14  }
  0x14   :  { %315 = vmatmul.msk.f32.gmra.mxu0 %vm134_vm1, %v23_v15  ;;  %321 = vmatmul.msk.f32.gmra.mxu2 %vm134_vm1, %v29_v16 }
  0x15   :  { %327 = vmatmul.msk.f32.gmra.mxu3 %vm134_vm1, %v35_v17 }
  0x16   :  { %96 = vperm.xlu1 %334, %v46_v18   ;;  %91 = vperm.xlu2 %335, %v45_v19  }
  0x1b   :  { %86 = vperm.xlu0 %333, %v44_v20  }
  0x1c   :  { %316 = vmatmul.msk.f32.gmra.mxu0 %vm134_vm1, %v24_v21  ;;  %322 = vmatmul.msk.f32.gmra.mxu2 %vm134_vm1, %v30_v22 }
  0x1d   :  { %328 = vmatmul.msk.f32.gmra.mxu3 %vm134_vm1, %v36_v23 }
  0x1e   :  { %81 = vperm.xlu1 %334, %v43_v24   ;;  %76 = vperm.xlu2 %335, %v42_v25  }
  0x23   :  { %71 = vperm.xlu0 %333, %v41_v26  }
  0x24   :  { %317 = vmatmul.msk.f32.gmra.mxu0 %vm134_vm1, %v25_v27  ;;  %323 = vmatmul.msk.f32.gmra.mxu2 %vm134_vm1, %v31_v28 }
  0x26   :  { %66 = vperm.xlu1 %334, %v40_v29   ;;  %61 = vperm.xlu2 %335, %v39_v30  }
  0x2b   :  { %56 = vperm.xlu0 %333, %v38_v31  }
  0x2c   :  { %318 = vmatmul.msk.f32.gmra.mxu0 %vm134_vm1, %v26_v32  ;;  %324 = vmatmul.msk.f32.gmra.mxu2 %vm134_vm1, %v32_v33 }
  0x2e   :  { %272 = vperm.xlu1 %334, %v269_v34  }
  0x60   :  { %v112_v43 = vpop.permute.xlu2 %111 }
  0x68   :  { %v107_v53 = vpop.permute.xlu2 %106 }
  0x70   :  { %v92_v0 = vpop.permute.xlu2 %91 }
  0x75   :  { %v132_v38 = vpop.permute.xlu0 %131 }
  0x78   :  { %v122_v42 = vpop.permute.xlu1 %121  ;;  %v77_v11 = vpop.permute.xlu2 %76 }
  0x7d   :  { %v127_v46 = vpop.permute.xlu0 %126 }
  0x80   :  { %v117_v52 = vpop.permute.xlu1 %116  ;;  %v62_v25 = vpop.permute.xlu2 %61 }
  0x81   :  { %v512_v35 = vpop.f32.mrf.mxu0 }
  0x85   :  { %v102_v56 = vpop.permute.xlu0 %101 }
  0x87   :  { %v222_v36 = vpop.f32.mrf.mxu2 }
  0x88   :  { %v240_v37 = vpop.f32.mrf.mxu3  ;;  %v97_v63 = vpop.permute.xlu1 %96 }
  0x89   :  { %v514_v39 = vpop.f32.mrf.mxu0  ;;  %v241_v58 = vadd.f32 %v240_v37, %v117_v52 }
  0x8a   :  { %v208_v30 = vadd.f32 %v514_v39, %v62_v25 }
  0x8b   :  { %v264_v62 = vmax.f32 %v241_v58, 0.0 }
  0x8c   :  { %v253_v33 = vmax.f32 %v208_v30, 0.0 }
  0x8d   :  { %v87_v1 = vpop.permute.xlu0 %86 }
  0x8e   :  { %v223_v16 = vadd.f32 %v222_v36, %v87_v1  ;;  %v268_v36 = vld [vmem:[%s527_s3] sm:$0xf] }
  0x8f   :  { %v225_v40 = vpop.f32.mrf.mxu2 }
  0x90   :  { %v243_v41 = vpop.f32.mrf.mxu3  ;;  %v82_v10 = vpop.permute.xlu1 %81  ;;  %v226_v12 = vadd.f32 %v225_v40, %v92_v0  ;;  %v258_v20 = vmax.f32 %v223_v16, 0.0 }
  0x91   :  { %v210_v47 = vpop.f32.mrf.mxu0  ;;  %v244_v54 = vadd.f32 %v243_v41, %v122_v42 }
  0x92   :  { %v259_v18 = vmax.f32 %v226_v12, 0.0 }
  0x93   :  { %v265_v60 = vmax.f32 %v244_v54, 0.0 }
  0x95   :  { %v72_v14 = vpop.permute.xlu0 %71 }
  0x97   :  { %v228_v44 = vpop.f32.mrf.mxu2 }
  0x98   :  { %v246_v45 = vpop.f32.mrf.mxu3  ;;  %v229_v8 = vadd.f32 %v228_v44, %v97_v63  ;;  %v67_v24 = vpop.permute.xlu1 %66 }
  0x99   :  { %v247_v50 = vadd.f32 %v246_v45, %v127_v46  ;;  %v213_v57 = vpop.f32.mrf.mxu0  ;;  %v211_v26 = vadd.f32 %v210_v47, %v67_v24 }
  0x9a   :  { %v260_v17 = vmax.f32 %v229_v8, 0.0  ;;  %v214_v22 = vadd.f32 %v213_v57, %v72_v14 }
  0x9b   :  { %v266_v59 = vmax.f32 %v247_v50, 0.0  ;;  %v254_v31 = vmax.f32 %v211_v26, 0.0 }
  0x9c   :  { %v255_v29 = vmax.f32 %v214_v22, 0.0 }
  0x9d   :  { %v57_v28 = vpop.permute.xlu0 %56 }
  0x9e   :  { %v205_v32 = vadd.f32 %v512_v35, %v57_v28 }
  0x9f   :  { %v231_v48 = vpop.f32.mrf.mxu2 }
  0xa0   :  { %v249_v49 = vpop.f32.mrf.mxu3  ;;  %v232_v6 = vadd.f32 %v231_v48, %v102_v56  ;;  %v252_v34 = vmax.f32 %v205_v32, 0.0  ;;  %v273_v37 = vpop.permute.xlu1 %272 }
  0xa1   :  { %v250_v51 = vadd.f32 %v249_v49, %v132_v38  ;;  %v216_v2 = vpop.f32.mrf.mxu0 }
  0xa2   :  { %v261_v13 = vmax.f32 %v232_v6, 0.0  ;;  %v217_v21 = vadd.f32 %v216_v2, %v77_v11 }
  0xa3   :  { %v267_v55 = vmax.f32 %v250_v51, 0.0 }
  0xa4   :  { %v256_v27 = vmax.f32 %v217_v21, 0.0 }
  0xa5   :  { %275 = vmatpush.msra.mxu1 %v267_v55 }
  0xa7   :  { %276 = vmatpush.msra.mxu1 %v266_v59  ;;  %v234_v61 = vpop.f32.mrf.mxu2 }
  0xa8   :  { %v235_v4 = vadd.f32 %v234_v61, %v107_v53 }
  0xa9   :  { %277 = vmatpush.msra.mxu1 %v265_v60  ;;  %v219_v15 = vpop.f32.mrf.mxu0 }
  0xaa   :  { %v262_v9 = vmax.f32 %v235_v4, 0.0  ;;  %v220_v19 = vadd.f32 %v219_v15, %v82_v10 }
  0xab   :  { %278 = vmatpush.msra.mxu1 %v264_v62 }
  0xac   :  { %v257_v23 = vmax.f32 %v220_v19, 0.0 }
  0xaf   :  { %v237_v3 = vpop.f32.mrf.mxu2 }
  0xb0   :  { %v238_v5 = vadd.f32 %v237_v3, %v112_v43 }
  0xb2   :  { %v263_v7 = vmax.f32 %v238_v5, 0.0 }
  0xb4   :  { %279 = vmatpush.msra.mxu1 %v263_v7 }
  0xb6   :  { %280 = vmatpush.msra.mxu1 %v262_v9 }
  0xb8   :  { %281 = vmatpush.msra.mxu1 %v261_v13 }
  0xba   :  { %282 = vmatpush.msra.mxu1 %v260_v17 }
  0xbc   :  { %283 = vmatpush.msra.mxu1 %v259_v18 }
  0xbe   :  { %284 = vmatpush.msra.mxu1 %v258_v20 }
  0xc0   :  { %285 = vmatpush.msra.mxu1 %v257_v23 }
  0xc2   :  { %286 = vmatpush.msra.mxu1 %v256_v27 }
  0xc4   :  { %287 = vmatpush.msra.mxu1 %v255_v29 }
  0xc6   :  { %288 = vmatpush.msra.mxu1 %v254_v31 }
  0xc8   :  { %289 = vmatpush.msra.mxu1 %v253_v33 }
  0xca   :  { %290 = vmatpush.msra.mxu1 %v252_v34 }
  0xcb   :  { %291 = vmatmul.f32.vlgmr.msra.gmra.mxu1 %v268_v36 }
 0x148   :  { %v292_v38 = vpop.f32.mrf.mxu1 }
 0x149   :  { %v293_v35 = vadd.f32 %v292_v38, %v273_v37 }
 0x14b   :  { %295 = vst [vmem:[#allocation2] sm:$0xf] %v293_v35 }
 0x14c   :  { %306 = dma.vmem_to_hbm [thread:$0]  %s302_s8, 64, %s304_s11, [#allocation3]  }
 0x14d   :  { %360 = dma.done.wait [#allocation3], 64  }
 0x14e   :  { %361 = vsyncadd [#allocation3], 4294967232 }
 0x14f   :  { %311 = vsyncpa [#allocation3], 1 }

</bundles_post_ra>
